<compile_context>
chip_gen: v7x
topology: tpu7x:2x2x1
jax: 0.10.0
libtpu: 0.0.40
codegen_flags: <defaults>
</compile_context>

<pallas_src>
import functools

import jax
import jax.numpy as jnp
from jax.experimental import pallas as pl
from jax.experimental.pallas import tpu as pltpu


def _tv_kernel(mh_ref, mw_ref, x_ref, o_ref, *, W):
    # mh_ref, mw_ref: (1, HWp) f32 lane masks, pre-scaled by 1/count_h, 1/count_w.
    # x_ref:          (TB, HWp) slab of flattened planes (one plane per row).
    # o_ref:          (1, 1) per-core partial sum, resident across the inner axis.
    i = pl.program_id(1)

    @pl.when(i == 0)
    def _():
        o_ref[...] = jnp.zeros(o_ref.shape, o_ref.dtype)

    x = x_ref[...].astype(jnp.float32)            # (TB, HWp)
    # Backward-neighbour shifted views via XLU lane rotation: roll(x, s)[p] == x[p-s].
    # Wrap-around and padding positions carry a 0 mask, so no boundary slices needed.
    x_left = pltpu.roll(x, shift=1, axis=1)       # x[p - 1]  (left neighbour)
    x_up = pltpu.roll(x, shift=W, axis=1)         # x[p - W]  (upper neighbour)

    dh = x - x_up
    dw = x - x_left
    v = dh * dh * mh_ref[...] + dw * dw * mw_ref[...]
    o_ref[...] += jnp.sum(v)


def _vmem_capacity_bytes():
    try:
        info = pltpu.get_tpu_info()
        cap = getattr(info, "vmem_capacity_bytes", None)
        if cap:
            return int(cap)
    except Exception:
        pass
    return 64 * 1024 * 1024   # conservative (v7x-sized) default


def total_variance_pallas(x, weight=1.0):
    """Pallas TPU implementation of the PyTorch `total_variance` forward pass."""
    B, C, H, W = x.shape
    N = B * C
    HW = H * W

    # Lane-dense flattened planes: last dim padded up to a multiple of 128.
    HWp = -(-HW // 128) * 128
    xr = x.reshape(N, HW)
    if HWp != HW:
        xr = jnp.pad(xr, ((0, 0), (0, HWp - HW)))

    # Per-generation budget: v5e/v6e have 128 MiB VMEM per TensorCore, v7x 64 MiB.
    vmem_cap = _vmem_capacity_bytes()
    if vmem_cap >= 96 * 1024 * 1024:
        target_bytes = 8 * 1024 * 1024
        vmem_limit = 64 * 1024 * 1024
    else:
        target_bytes = 4 * 1024 * 1024
        vmem_limit = 40 * 1024 * 1024

    # Planes per grid step: target_bytes slabs, multiple of 8 sublanes; the
    # double-buffered input must also fit the VMEM limit with headroom.
    tb = (target_bytes // (HWp * 4)) // 8 * 8
    TB = int(max(8, tb))
    TB = min(TB, -(-N // 8) * 8)          # never (much) bigger than N
    max_tb = max(8, ((vmem_limit - (8 << 20)) // (2 * HWp * 4)) // 8 * 8)
    TB = int(min(TB, max_tb))
    # TODO(synk): for very large planes (H*W*4 >> target_bytes) tile the lane
    # axis with a W-column halo instead of clamping TB to 8 whole planes.

    num_blocks = -(-N // TB)
    # Split blocks over both TensorCores (v7x megacore) when there is enough work.
    num_cores = 2 if num_blocks >= 2 else 1
    num_blocks = -(-num_blocks // num_cores) * num_cores
    blocks_per_core = num_blocks // num_cores
    Npad = num_blocks * TB
    if Npad != N:
        xr = jnp.pad(xr, ((0, Npad - N), (0, 0)))

    # Hoisted lane masks (computed once here, constant-index input to the kernel),
    # pre-scaled by the normalisation counts so the kernel has one fused term.
    count_h = C * (H - 1) * W   # tensor_size of x[:, :, 1:, :]
    count_w = C * H * (W - 1)   # tensor_size of x[:, :, :, 1:]
    # TODO(synk): H == 1 or W == 1 makes a count zero; torch returns NaN there,
    # here that term contributes 0 instead of poisoning the whole sum.
    col = jnp.arange(HWp, dtype=jnp.int32)      # flattened h*W + w
    real = col < HW                              # ignore lane-padding columns
    m_h = (((col >= W) & real).astype(jnp.float32) / max(count_h, 1))[None, :]
    m_w = ((((col % W) != 0) & real).astype(jnp.float32) / max(count_w, 1))[None, :]

    kernel = functools.partial(_tv_kernel, W=W)

    parts = pl.pallas_call(
        kernel,
        out_shape=jax.ShapeDtypeStruct((num_cores, 1, 1), jnp.float32),
        grid_spec=pltpu.PrefetchScalarGridSpec(
            num_scalar_prefetch=0,
            grid=(num_cores, blocks_per_core),
            in_specs=[
                pl.BlockSpec((1, HWp), lambda c, i: (0, 0)),
                pl.BlockSpec((1, HWp), lambda c, i: (0, 0)),
                pl.BlockSpec(
                    (TB, HWp),
                    lambda c, i: (c * blocks_per_core + i, 0),
                ),
            ],
            out_specs=pl.BlockSpec((None, 1, 1), lambda c, i: (c, 0, 0)),
        ),
        compiler_params=pltpu.CompilerParams(
            dimension_semantics=("parallel", "arbitrary"),
            vmem_limit_bytes=vmem_limit,
        ),
    )(m_h, m_w, xr)

    return weight * 2.0 * jnp.sum(parts) / B


def total_variance_ref(x, weight=1.0):
    B, C, H, W = x.shape
    xf = x.astype(jnp.float32)
    count_h = C * (H - 1) * W
    count_w = C * H * (W - 1)
    h_tv = jnp.sum((xf[:, :, 1:, :] - xf[:, :, :-1, :]) ** 2)
    w_tv = jnp.sum((xf[:, :, :, 1:] - xf[:, :, :, :-1]) ** 2)
    return weight * 2.0 * (h_tv / count_h + w_tv / count_w) / B


if __name__ == "__main__":
    key = jax.random.PRNGKey(0)
    B, C, H, W = 2, 4, 16, 16
    x = jax.random.normal(key, (B, C, H, W), dtype=jnp.float32)

    out = jax.block_until_ready(total_variance_pallas(x, weight=1.0))
    ref = jax.block_until_ready(total_variance_ref(x, weight=1.0))

    assert jnp.allclose(out, ref, rtol=1e-5, atol=1e-5), (out, ref)
    print("KERNEL_OK")
</pallas_src>

<mosaic_0001>
module attributes {stable_mosaic.version = 11 : i64} {
  func.func @_tv_kernel(%arg0: i32, %arg1: i32, %arg2: memref<1x256xf32, #tpu.memory_space<vmem>>, %arg3: memref<1x256xf32, #tpu.memory_space<vmem>>, %arg4: memref<8x256xf32, #tpu.memory_space<vmem>>, %arg5: memref<1x1x1xf32, #tpu.memory_space<vmem>>) attributes {dimension_semantics = [#tpu.dimension_semantics<parallel>, #tpu.dimension_semantics<arbitrary>], iteration_bounds = array<i64: 1, 1>, scalar_prefetch = 0 : i64, scratch_operands = 0 : i64, tpu.core_type = #tpu.core_type<tc>, window_params = [{pipeline_mode = #tpu.pipeline_mode<synchronous>, transform_indices = @transform_0, window_bounds = array<i64: 1, 256>}, {pipeline_mode = #tpu.pipeline_mode<synchronous>, transform_indices = @transform_1, window_bounds = array<i64: 1, 256>}, {transform_indices = @transform_2, window_bounds = array<i64: 8, 256>}, {transform_indices = @transform_3, window_bounds = array<i64: 1, 1, 1>}]} {
    %c0_i32 = arith.constant 0 : i32
    %0 = arith.cmpi eq, %arg1, %c0_i32 : i32
    %1 = arith.extui %0 : i1 to i32
    %c0_i32_0 = arith.constant 0 : i32
    %2 = arith.cmpi ne, %1, %c0_i32_0 : i32
    scf.if %2 {
      %cst_12 = arith.constant 0.000000e+00 : f32
      %28 = vector.broadcast %cst_12 : f32 to vector<1x1xf32>
      %c0_13 = arith.constant 0 : index
      %c0_14 = arith.constant 0 : index
      %c0_15 = arith.constant 0 : index
      %29 = vector.load %arg5[%c0_13, %c0_14, %c0_15] : memref<1x1x1xf32, #tpu.memory_space<vmem>>, vector<1x1x1xf32>
      %30 = vector.shape_cast %29 : vector<1x1x1xf32> to vector<1x1xf32>
      %31 = vector.shape_cast %28 : vector<1x1xf32> to vector<1x1x1xf32>
      tpu.vector_store %arg5[%c0_13, %c0_14, %c0_15], %31 {strides = array<i32>} : memref<1x1x1xf32, #tpu.memory_space<vmem>>, vector<1x1x1xf32>,
    } else {
    }
    %c0 = arith.constant 0 : index
    %c0_1 = arith.constant 0 : index
    %3 = vector.load %arg4[%c0, %c0_1] : memref<8x256xf32, #tpu.memory_space<vmem>>, vector<8x256xf32>
    %c1_i32 = arith.constant 1 : i32
    %4 = tpu.dynamic_rotate %3 by %c1_i32 dim 1 : vector<8x256xf32>, i32 -> vector<8x256xf32>
    %c16_i32 = arith.constant 16 : i32
    %5 = tpu.dynamic_rotate %3 by %c16_i32 dim 1 : vector<8x256xf32>, i32 -> vector<8x256xf32>
    %6 = arith.subf %3, %5 : vector<8x256xf32>
    %7 = arith.subf %3, %4 : vector<8x256xf32>
    %8 = arith.mulf %6, %6 : vector<8x256xf32>
    %c0_2 = arith.constant 0 : index
    %c0_3 = arith.constant 0 : index
    %9 = vector.load %arg2[%c0_2, %c0_3] : memref<1x256xf32, #tpu.memory_space<vmem>>, vector<1x256xf32>
    %10 = vector.broadcast %9 : vector<1x256xf32> to vector<8x256xf32>
    %11 = arith.mulf %8, %10 : vector<8x256xf32>
    %12 = arith.mulf %7, %7 : vector<8x256xf32>
    %c0_4 = arith.constant 0 : index
    %c0_5 = arith.constant 0 : index
    %13 = vector.load %arg3[%c0_4, %c0_5] : memref<1x256xf32, #tpu.memory_space<vmem>>, vector<1x256xf32>
    %14 = vector.broadcast %13 : vector<1x256xf32> to vector<8x256xf32>
    %15 = arith.mulf %12, %14 : vector<8x256xf32>
    %16 = arith.addf %11, %15 : vector<8x256xf32>
    %c0_6 = arith.constant 0 : index
    %c0_7 = arith.constant 0 : index
    %c0_8 = arith.constant 0 : index
    %17 = vector.load %arg5[%c0_6, %c0_7, %c0_8] : memref<1x1x1xf32, #tpu.memory_space<vmem>>, vector<1x1x1xf32>
    %18 = vector.shape_cast %17 : vector<1x1x1xf32> to vector<1x1xf32>
    %19 = vector.shape_cast %16 : vector<8x256xf32> to vector<1x8x256xf32>
    %cst = arith.constant dense<0.000000e+00> : vector<1xf32>
    %20 = vector.multi_reduction <add>, %19, %cst [1, 2] : vector<1x8x256xf32> to vector<1xf32>
    %21 = vector.shape_cast %20 : vector<1xf32> to vector<1x1x1xf32>
    %22 = vector.extract %21[0, 0, 0] : f32 from vector<1x1x1xf32>
    %23 = vector.broadcast %22 : f32 to vector<1x1xf32>
    %24 = arith.addf %18, %23 : vector<1x1xf32>
    %c0_9 = arith.constant 0 : index
    %c0_10 = arith.constant 0 : index
    %c0_11 = arith.constant 0 : index
    %25 = vector.load %arg5[%c0_9, %c0_10, %c0_11] : memref<1x1x1xf32, #tpu.memory_space<vmem>>, vector<1x1x1xf32>
    %26 = vector.shape_cast %25 : vector<1x1x1xf32> to vector<1x1xf32>
    %27 = vector.shape_cast %24 : vector<1x1xf32> to vector<1x1x1xf32>
    tpu.vector_store %arg5[%c0_9, %c0_10, %c0_11], %27 {strides = array<i32>} : memref<1x1x1xf32, #tpu.memory_space<vmem>>, vector<1x1x1xf32>,
    return
  }
  func.func @transform_0(%arg0: i32, %arg1: i32) -> (i32, i32) {
    %c0_i32 = arith.constant 0 : i32
    %c0_i32_0 = arith.constant 0 : i32
    %c0_i32_1 = arith.constant 0 : i32
    return %c0_i32, %c0_i32_0 : i32, i32
  }
  func.func @transform_1(%arg0: i32, %arg1: i32) -> (i32, i32) {
    %c0_i32 = arith.constant 0 : i32
    %c0_i32_0 = arith.constant 0 : i32
    %c0_i32_1 = arith.constant 0 : i32
    return %c0_i32, %c0_i32_0 : i32, i32
  }
  func.func @transform_2(%arg0: i32, %arg1: i32) -> (i32, i32) {
    %c1_i32 = arith.constant 1 : i32
    %0 = arith.muli %arg0, %c1_i32 : i32
    %1 = arith.addi %0, %arg1 : i32
    %c0_i32 = arith.constant 0 : i32
    %c0_i32_0 = arith.constant 0 : i32
    return %1, %c0_i32 : i32, i32
  }
  func.func @transform_3(%arg0: i32, %arg1: i32) -> (i32, i32, i32) {
    %c0_i32 = arith.constant 0 : i32
    %c0_i32_0 = arith.constant 0 : i32
    %c0_i32_1 = arith.constant 0 : i32
    return %arg0, %c0_i32, %c0_i32_0 : i32, i32, i32
  }
}

</mosaic_0001>

<bundles_post_ra>
// kernel: tpu_custom_call.1
= control target key start
LH: loop header
LB: loop body
LE: loop exit
PB: predicated region body
PF: predicated region fallthrough
CT: control target
= control target key end

     0   :  { %8 = vsyncpa [#allocation3], 0  ;;  %s284_s0 = inlined_call_operand.hbm [shape: f32[1,256], index: 0, kind: input, shape index: {}]   ;;  %s285_s1 = inlined_call_operand.vmem [shape: f32[1,256], index: 1, kind: input, shape index: {}]   ;;  %s286_s2 = inlined_call_operand.hbm [shape: f32[8,256], index: 2, kind: input, shape index: {}]   ;;  %s287_s3 = inlined_call_operand.hbm [shape: f32[1,1,1], index: 3, kind: output, shape index: {}]  }
   0x1   :  { %9 = vsyncpa [#allocation6], 0 }
   0x2   :  { %10 = vsyncpa [#allocation4], 0  ;;  %s217_s12 = smov [#allocation2]   ;;  %s218_s14 = smov [#allocation5]  }
   0x3   :  { %s17_s13 = sshll.u32 %s217_s12, 4  ;;  %s33_s15 = sshll.u32 %s218_s14, 4  ;;  %s18_s13 = int_to_ptr.vmem [resolvable:$true] %s17_s13  ;;  %s34_s15 = int_to_ptr.vmem [resolvable:$true] %s33_s15 }
   0x4   :  { %s145_s18 = scalar_lea.hbm %s284_s0, 32 }
   0x5   :  { %p146_p0 = scmp.ne.s32.totalorder %s284_s0, %s145_s18  ;;  %p149_p1 = scmp.lt.u32.totalorder %s145_s18, %s284_s0 }
   0x7   :  { %p151_p2 = pnand %p149_p1, %p146_p0 }
   0x9   :  { %154 = shalt.err (!%p151_p2)
}
   0xa   :  { %s155_s23 = scalar_lea.vmem %s18_s13, 32  ;;  %p160_p4 = scmp.lt.s32.totalorder %s18_s13, %s18_s13 }
   0xb   :  { %p156_p3 = scmp.ne.s32.totalorder %s18_s13, %s155_s23  ;;  %p161_p5 = scmp.lt.s32.totalorder %s155_s23, %s155_s23 }
   0xd   :  { %p162_p6 = por %p161_p5, %p160_p4 }
   0xf   :  { %p163_p7 = pnand %p162_p6, %p156_p3 }
  0x11   :  { %166 = shalt.err (!%p163_p7)
}
  0x12   :  { %20 = dma.hbm_to_vmem [thread:$0]  %s284_s0, 32, %s18_s13, [#allocation3]  }
  0x13   :  { %s167_s28 = scalar_lea.hbm %s286_s2, 256 }
  0x14   :  { %p168_p8 = scmp.ne.s32.totalorder %s286_s2, %s167_s28  ;;  %p171_p9 = scmp.lt.u32.totalorder %s167_s28, %s286_s2 }
  0x16   :  { %p173_p10 = pnand %p171_p9, %p168_p8 }
  0x18   :  { %176 = shalt.err (!%p173_p10)
}
  0x19   :  { %s177_s6 = scalar_lea.vmem %s34_s15, 256  ;;  %p182_p12 = scmp.lt.s32.totalorder %s34_s15, %s34_s15 }
  0x1a   :  { %p178_p11 = scmp.ne.s32.totalorder %s34_s15, %s177_s6  ;;  %p183_p13 = scmp.lt.s32.totalorder %s177_s6, %s177_s6 }
  0x1c   :  { %p184_p0 = por %p183_p13, %p182_p12 }
  0x1e   :  { %p185_p1 = pnand %p184_p0, %p178_p11 }
  0x20   :  { %188 = shalt.err (!%p185_p1)
}
  0x21   :  { %36 = dma.hbm_to_vmem [thread:$0]  %s286_s2, 256, %s34_s15, [#allocation6]  }
  0x22   :  { %211 = dma.done.wait [#allocation3], 32  }
  0x23   :  { %212 = vsyncadd [#allocation3], 4294967264 }
  0x24   :  { %213 = dma.done.wait [#allocation6], 256  }
  0x25   :  { %214 = vsyncadd [#allocation6], 4294967040  ;;  %vm48_vm0 = vcmask 0   ;;  %v219_v0 = vmov 0.0   ;;  %v50_v1 = vld [vmem:[#allocation5] sm:$0xff]  ;;  %s220_s8 = smov 16   ;;  %v56_v3 = vlaneseq }
  0x26   :  { %49 = vst.msk [vmem:[#allocation7] sm:$0x1] %vm48_vm0, %v219_v0  ;;  %61 = vrot.lane.b32.xlu1 %v50_v1, %s220_s8  ;;  %s221_s9 = smov 1   ;;  %v51_v2 = vld [vmem:[#allocation5 + $0x8] sm:$0xff]  ;;  %v74_v10 = vld [vmem:[#allocation2] sm:$0x3] }
  0x27   :  { %52 = vrot.lane.b32.xlu0 %v50_v1, %s221_s9  ;;  %v77_v4 = vshrl.u32 %v56_v3, 7  ;;  %v57_v5 = vand.u32 127, %v56_v3  ;;  %v90_v11 = vld [vmem:[%s285_s1] sm:$0x3]  ;;  %s222_s1 = smov [#allocation7]  }
  0x28   :  { %s127_s11 = sshll.u32 %s222_s1, 4  ;;  %s128_s11 = int_to_ptr.vmem [resolvable:$true] %s127_s11 }
  0x29   :  { %v78_v8 = vsub.s32 0, %v77_v4  ;;  %v82_v9 = vsub.s32 1, %v77_v4  ;;  %vm65_vm1 = vcmp.lt.s32.totalorder %v57_v5, 16  ;;  %vm58_vm2 = vcmp.lt.s32.totalorder %v57_v5, 1  ;;  %s189_s13 = scalar_lea.vmem %s128_s11, 16  ;;  %s193_s14 = scalar_lea.vmem %s128_s11, 32 }
  0x2a   :  { %63 = vrot.lane.b32.xlu1 %v51_v2, %s220_s8  ;;  %p190_p2 = scmp.ne.s32.totalorder %s128_s11, %s189_s13  ;;  %p194_p3 = scmp.lt.s32.totalorder %s128_s11, %s128_s11 }
  0x2b   :  { %54 = vrot.lane.b32.xlu0 %v51_v2, %s221_s9  ;;  %v79_v12 = vrot.slane %v74_v10, %v78_v8  ;;  %v83_v13 = vrot.slane %v74_v10, %v82_v9  ;;  %v95_v15 = vrot.slane %v90_v11, %v78_v8  ;;  %v99_v16 = vrot.slane %v90_v11, %v82_v9  ;;  %p195_p4 = scmp.lt.s32.totalorder %s193_s14, %s189_s13 }
  0x2d   :  { %v106_v44 = vld [vmem:[#allocation7] sm:$0x1]  ;;  %p196_p5 = por %p195_p4, %p194_p3 }
  0x2f   :  { %p197_p6 = pnand %p196_p5, %p190_p2 }
  0x98   :  { %v62_v6 = vpop.permute.xlu1 %61 }
  0x99   :  { %v53_v7 = vpop.permute.xlu0 %52 }
  0x9c   :  { %v64_v14 = vpop.permute.xlu1 %63 }
  0x9d   :  { %v55_v17 = vpop.permute.xlu0 %54  ;;  %v66_v18 = vsel %vm65_vm1, %v62_v6, %v64_v14  ;;  %v67_v19 = vsel %vm65_vm1, %v64_v14, %v62_v6 }
  0x9e   :  { %v59_v20 = vsel %vm58_vm2, %v53_v7, %v55_v17  ;;  %v60_v21 = vsel %vm58_vm2, %v55_v17, %v53_v7  ;;  %v68_v22 = vsub.f32 %v50_v1, %v67_v19  ;;  %v69_v23 = vsub.f32 %v51_v2, %v66_v18 }
  0x9f   :  { %v70_v24 = vsub.f32 %v50_v1, %v60_v21  ;;  %v71_v25 = vsub.f32 %v51_v2, %v59_v20 }
  0xa0   :  { %v72_v26 = vmul.f32 %v68_v22, %v68_v22  ;;  %v73_v27 = vmul.f32 %v69_v23, %v69_v23 }
  0xa1   :  { %v88_v28 = vmul.f32 %v70_v24, %v70_v24  ;;  %v89_v29 = vmul.f32 %v71_v25, %v71_v25 }
  0xa2   :  { %v86_v30 = vmul.f32 %v79_v12, %v72_v26  ;;  %v87_v31 = vmul.f32 %v83_v13, %v73_v27 }
  0xa3   :  { %v102_v32 = vmul.f32 %v95_v15, %v88_v28  ;;  %v103_v33 = vmul.f32 %v99_v16, %v89_v29 }
  0xa5   :  { %v104_v34 = vadd.f32 %v102_v32, %v86_v30  ;;  %v105_v35 = vadd.f32 %v103_v33, %v87_v31 }
  0xa7   :  { %v107_v36 = vadd.f32 %v105_v35, %v104_v34 }
  0xa9   :  { %108 = vadd.xlane.f32.xlu0 %v107_v36 }
 0x136   :  { %v109_v37 = vpop.xlane.xlu0 %108 }
 0x137   :  { %v110_v38 = vrot.slane %v109_v37, 4 }
 0x139   :  { %v111_v39 = vadd.f32 %v110_v38, %v109_v37 }
 0x13b   :  { %v112_v40 = vrot.slane %v111_v39, 2 }
 0x13d   :  { %v113_v41 = vadd.f32 %v112_v40, %v111_v39 }
 0x13f   :  { %v114_v42 = vrot.slane %v113_v41, 1 }
 0x141   :  { %v115_v43 = vadd.f32 %v114_v42, %v113_v41 }
 0x143   :  { %137 = vpush %v115_v43 }
 0x174   :  { %s138_s12 = spop %137 }
 0x175   :  { %v117_v45 = vstv %s138_s12 }
 0x176   :  { %v118_v46 = vadd.f32 %v117_v45, %v106_v44 }
 0x178   :  { %120 = vst.msk [vmem:[#allocation7] sm:$0x1] %vm48_vm0, %v118_v46 }
 0x179   :  { %200 = shalt.err (!%p197_p6)
}
 0x17a   :  { %s201_s17 = scalar_lea.hbm %s287_s3, 16 }
 0x17b   :  { %p202_p7 = scmp.ne.s32.totalorder %s287_s3, %s201_s17  ;;  %p205_p8 = scmp.lt.u32.totalorder %s201_s17, %s287_s3 }
 0x17d   :  { %p207_p9 = pnand %p205_p8, %p202_p7 }
 0x17f   :  { %210 = shalt.err (!%p207_p9)
}
 0x180   :  { %130 = dma.vmem_to_hbm [thread:$0]  %s128_s11, 16, %s287_s3, [#allocation4]  }
 0x181   :  { %215 = dma.done.wait [#allocation4], 16  }
 0x182   :  { %216 = vsyncadd [#allocation4], 4294967280 }
 0x183   :  { %134 = vsyncpa [#allocation3], 1 }
 0x184   :  { %135 = vsyncpa [#allocation6], 1 }
 0x185   :  { %136 = vsyncpa [#allocation4], 1 }

</bundles_post_ra>
